<compile_context>
chip_gen: v6e
topology: v6e:2x2x1
jax: 0.10.0
libtpu: 0.0.40
codegen_flags: <defaults>
</compile_context>

<pallas_src>
import functools

import jax
import jax.numpy as jnp
from jax.experimental import pallas as pl
from jax.experimental.pallas import tpu as pltpu


def _round_up(x, m):
    return ((x + m - 1) // m) * m


def _small_k_matmul(x, w, init=None):
    """x: (TB, K) with tiny K, w: (K, N).  Unrolled VPU broadcast-FMA.

    Avoids an MXU push/pop that would be <2% utilized at K<=4; the multiplies/adds
    land in otherwise-idle VALU slots.  `init` (e.g. the bias row) seeds the
    accumulator so the bias add is folded away.
    """
    k_dim = w.shape[0]
    acc = x[:, 0:1] * w[0:1, :]
    if init is not None:
        acc = acc + init
    for k in range(1, k_dim):
        acc = acc + x[:, k:k + 1] * w[k:k + 1, :]
    return acc


def _network_kernel(s_ref, w1_ref, b1_ref, w2_ref, b2_ref,
                    w3s_ref, w3h_ref, b3_ref, o_ref):
    s = s_ref[...]                                              # (TB, F) f32

    # fc1 + tanh  (K = input_size = 4 -> VPU broadcast-FMA, bias folded into init)
    h1 = jnp.tanh(_small_k_matmul(s, w1_ref[...], init=b1_ref[...]))     # (TB, 30)

    # fc2 + relu  (K = 30 -> MXU; dropout p=0.2 -> identity in eval mode)
    h2 = jnp.maximum(
        jnp.dot(h1, w2_ref[...], preferred_element_type=jnp.float32) + b2_ref[...],
        0.0,
    )                                                                    # (TB, 30)

    # fc3 over cat([state, h2], axis=1), expressed as a split matmul:
    #   state @ W3[:F]  (VPU, K=4, bias folded)  +  h2 @ W3[F:]  (MXU, K=30)
    q = (_small_k_matmul(s, w3s_ref[...], init=b3_ref[...])
         + jnp.dot(h2, w3h_ref[...], preferred_element_type=jnp.float32))

    # final dropout p=0.2 -> identity in eval mode
    o_ref[...] = q                                              # (TB, nb_action)


@functools.partial(jax.jit, static_argnames=("tb",))
def network_forward(state, params, *, tb=1024):
    """Forward pass of the DQN Network. state: (B, input_size) float32."""
    B, F = state.shape
    nb_action = params["b3"].shape[-1]
    H = params["w2"].shape[0]                       # 30

    # Batch tile: multiple of 8, capped at 1024, and chosen so the grid has >= 2
    # steps whenever B allows it (so v7x megacore gets both TensorCores busy).
    tb = max(8, min(_round_up(tb, 8), _round_up(pl.cdiv(B, 2), 8), 1024))
    grid = (pl.cdiv(B, tb),)

    batch_spec = pl.BlockSpec((tb, F), lambda i: (i, 0))
    out_spec = pl.BlockSpec((tb, nb_action), lambda i: (i, 0))

    def resident(arr):  # full-array block, constant index -> DMA'd once, stays in VMEM
        return pl.BlockSpec(arr.shape, lambda i: (0, 0))

    cost = pl.CostEstimate(
        flops=2 * B * (F * H + H * H + (F + H) * nb_action),
        transcendentals=B * H,
        bytes_accessed=4 * (B * F + B * nb_action
                            + F * H + H + H * H + H
                            + (F + H) * nb_action + nb_action),
    )

    return pl.pallas_call(
        _network_kernel,
        out_shape=jax.ShapeDtypeStruct((B, nb_action), jnp.float32),
        grid=grid,
        in_specs=[
            batch_spec,
            resident(params["w1"]), resident(params["b1"]),
            resident(params["w2"]), resident(params["b2"]),
            resident(params["w3_state"]), resident(params["w3_hidden"]),
            resident(params["b3"]),
        ],
        out_specs=out_spec,
        compiler_params=pltpu.CompilerParams(
            dimension_semantics=("parallel",),   # megacore batch sharding on v7x
        ),
        cost_estimate=cost,
    )(
        state,
        params["w1"], params["b1"],
        params["w2"], params["b2"],
        params["w3_state"], params["w3_hidden"], params["b3"],
    )


def init_params(key, input_size, nb_action):
    """Deterministic PyTorch-style Linear init: U(-1/sqrt(fan_in), 1/sqrt(fan_in)).

    fc3 is pre-split into the rows multiplying `state` and the rows multiplying the
    hidden activation so the kernel never needs an in-kernel concat or per-call pad.
    """
    hidden = 30
    cat_dim = input_size + hidden  # must equal 34 (fc3 in_features)
    assert cat_dim == 34, "fc3 expects 34 input features => input_size must be 4"

    k1, k2, k3, k4, k5, k6 = jax.random.split(key, 6)

    def uni(k, shape, fan_in):
        bound = 1.0 / jnp.sqrt(jnp.float32(fan_in))
        return jax.random.uniform(k, shape, jnp.float32, -bound, bound)

    w1 = uni(k1, (input_size, hidden), input_size)
    b1 = uni(k2, (1, hidden), input_size)
    w2 = uni(k3, (hidden, hidden), hidden)
    b2 = uni(k4, (1, hidden), hidden)
    w3 = uni(k5, (cat_dim, nb_action), cat_dim)
    b3 = uni(k6, (1, nb_action), cat_dim)

    return {
        "w1": w1, "b1": b1,
        "w2": w2, "b2": b2,
        "w3_state": w3[:input_size, :],   # rows multiplying `state`
        "w3_hidden": w3[input_size:, :],  # rows multiplying the hidden activation
        "b3": b3,
    }


def reference_forward(state, params):
    """Pure-JAX reference mirroring the PyTorch forward (dropout in eval mode)."""
    h1 = jnp.tanh(state @ params["w1"] + params["b1"])
    h2 = jnp.maximum(h1 @ params["w2"] + params["b2"], 0.0)
    x = jnp.concatenate([state, h2], axis=1)
    w3 = jnp.concatenate([params["w3_state"], params["w3_hidden"]], axis=0)
    return x @ w3 + params["b3"]


if __name__ == "__main__":
    input_size = 4   # forced by fc3 = Linear(34, nb_action): 4 + 30 = 34
    nb_action = 3

    key = jax.random.PRNGKey(0)
    kp, kx1, kx2 = jax.random.split(key, 3)
    params = init_params(kp, input_size, nb_action)

    # Small, spec-consistent batch (single partial tile: block masking on read+write).
    state_small = jax.random.normal(kx1, (2, input_size), jnp.float32)
    q_small = jax.block_until_ready(network_forward(state_small, params))
    assert q_small.shape == (2, nb_action)
    assert jnp.allclose(q_small, reference_forward(state_small, params),
                        atol=1e-4, rtol=1e-4), "mismatch vs reference (B=2)"

    # Larger batch exercising the grid: multiple tiles + partial last tile.
    state_big = jax.random.normal(kx2, (500, input_size), jnp.float32)
    q_big = jax.block_until_ready(network_forward(state_big, params, tb=128))
    assert q_big.shape == (500, nb_action)
    assert jnp.allclose(q_big, reference_forward(state_big, params),
                        atol=1e-4, rtol=1e-4), "mismatch vs reference (B=500)"

    print("KERNEL_OK")
</pallas_src>

<mosaic_0001>
module attributes {stable_mosaic.version = 11 : i64} {
  func.func @_network_kernel(%arg0: i32, %arg1: memref<8x4xf32, #tpu.memory_space<vmem>>, %arg2: memref<4x30xf32, #tpu.memory_space<vmem>>, %arg3: memref<1x30xf32, #tpu.memory_space<vmem>>, %arg4: memref<30x30xf32, #tpu.memory_space<vmem>>, %arg5: memref<1x30xf32, #tpu.memory_space<vmem>>, %arg6: memref<4x3xf32, #tpu.memory_space<vmem>>, %arg7: memref<30x3xf32, #tpu.memory_space<vmem>>, %arg8: memref<1x3xf32, #tpu.memory_space<vmem>>, %arg9: memref<8x3xf32, #tpu.memory_space<vmem>>) attributes {dimension_semantics = [#tpu.dimension_semantics<parallel>], iteration_bounds = array<i64: 1>, scalar_prefetch = 0 : i64, scratch_operands = 0 : i64, tpu.core_type = #tpu.core_type<tc>, window_params = [{transform_indices = @transform_0, window_bounds = array<i64: 8, 4>}, {pipeline_mode = #tpu.pipeline_mode<synchronous>, transform_indices = @transform_1, window_bounds = array<i64: 4, 30>}, {pipeline_mode = #tpu.pipeline_mode<synchronous>, transform_indices = @transform_2, window_bounds = array<i64: 1, 30>}, {pipeline_mode = #tpu.pipeline_mode<synchronous>, transform_indices = @transform_3, window_bounds = array<i64: 30, 30>}, {pipeline_mode = #tpu.pipeline_mode<synchronous>, transform_indices = @transform_4, window_bounds = array<i64: 1, 30>}, {pipeline_mode = #tpu.pipeline_mode<synchronous>, transform_indices = @transform_5, window_bounds = array<i64: 4, 3>}, {pipeline_mode = #tpu.pipeline_mode<synchronous>, transform_indices = @transform_6, window_bounds = array<i64: 30, 3>}, {pipeline_mode = #tpu.pipeline_mode<synchronous>, transform_indices = @transform_7, window_bounds = array<i64: 1, 3>}, {transform_indices = @transform_8, window_bounds = array<i64: 8, 3>}]} {
    %c0 = arith.constant 0 : index
    %c0_0 = arith.constant 0 : index
    %0 = vector.load %arg1[%c0, %c0_0] : memref<8x4xf32, #tpu.memory_space<vmem>>, vector<8x4xf32>
    %c0_1 = arith.constant 0 : index
    %c0_2 = arith.constant 0 : index
    %1 = vector.load %arg2[%c0_1, %c0_2] : memref<4x30xf32, #tpu.memory_space<vmem>>, vector<4x30xf32>
    %c0_3 = arith.constant 0 : index
    %c0_4 = arith.constant 0 : index
    %2 = vector.load %arg3[%c0_3, %c0_4] : memref<1x30xf32, #tpu.memory_space<vmem>>, vector<1x30xf32>
    %3 = vector.extract_strided_slice %0 {offsets = [0, 0], sizes = [8, 1], strides = [1, 1]} : vector<8x4xf32> to vector<8x1xf32>
    %4 = vector.extract_strided_slice %1 {offsets = [0, 0], sizes = [1, 30], strides = [1, 1]} : vector<4x30xf32> to vector<1x30xf32>
    %5 = vector.broadcast %3 : vector<8x1xf32> to vector<8x30xf32>
    %6 = vector.broadcast %4 : vector<1x30xf32> to vector<8x30xf32>
    %7 = arith.mulf %5, %6 : vector<8x30xf32>
    %8 = vector.broadcast %2 : vector<1x30xf32> to vector<8x30xf32>
    %9 = arith.addf %7, %8 : vector<8x30xf32>
    %10 = vector.extract_strided_slice %0 {offsets = [0, 1], sizes = [8, 1], strides = [1, 1]} : vector<8x4xf32> to vector<8x1xf32>
    %11 = vector.extract_strided_slice %1 {offsets = [1, 0], sizes = [1, 30], strides = [1, 1]} : vector<4x30xf32> to vector<1x30xf32>
    %12 = vector.broadcast %10 : vector<8x1xf32> to vector<8x30xf32>
    %13 = vector.broadcast %11 : vector<1x30xf32> to vector<8x30xf32>
    %14 = arith.mulf %12, %13 : vector<8x30xf32>
    %15 = arith.addf %9, %14 : vector<8x30xf32>
    %16 = vector.extract_strided_slice %0 {offsets = [0, 2], sizes = [8, 1], strides = [1, 1]} : vector<8x4xf32> to vector<8x1xf32>
    %17 = vector.extract_strided_slice %1 {offsets = [2, 0], sizes = [1, 30], strides = [1, 1]} : vector<4x30xf32> to vector<1x30xf32>
    %18 = vector.broadcast %16 : vector<8x1xf32> to vector<8x30xf32>
    %19 = vector.broadcast %17 : vector<1x30xf32> to vector<8x30xf32>
    %20 = arith.mulf %18, %19 : vector<8x30xf32>
    %21 = arith.addf %15, %20 : vector<8x30xf32>
    %22 = vector.extract_strided_slice %0 {offsets = [0, 3], sizes = [8, 1], strides = [1, 1]} : vector<8x4xf32> to vector<8x1xf32>
    %23 = vector.extract_strided_slice %1 {offsets = [3, 0], sizes = [1, 30], strides = [1, 1]} : vector<4x30xf32> to vector<1x30xf32>
    %24 = vector.broadcast %22 : vector<8x1xf32> to vector<8x30xf32>
    %25 = vector.broadcast %23 : vector<1x30xf32> to vector<8x30xf32>
    %26 = arith.mulf %24, %25 : vector<8x30xf32>
    %27 = arith.addf %21, %26 : vector<8x30xf32>
    %28 = math.tanh %27 : vector<8x30xf32>
    %c0_5 = arith.constant 0 : index
    %c0_6 = arith.constant 0 : index
    %29 = vector.load %arg4[%c0_5, %c0_6] : memref<30x30xf32, #tpu.memory_space<vmem>>, vector<30x30xf32>
    %cst = arith.constant dense<0.000000e+00> : vector<8x30xf32>
    %30 = tpu.matmul %28, %29, %cst {dimension_numbers = #tpu.dot_dimension_numbers<[1], [0], [0], [1], [0, 0, 1, 1], [], []>} : vector<8x30xf32>, vector<30x30xf32>, vector<8x30xf32> -> vector<8x30xf32>
    %c0_7 = arith.constant 0 : index
    %c0_8 = arith.constant 0 : index
    %31 = vector.load %arg5[%c0_7, %c0_8] : memref<1x30xf32, #tpu.memory_space<vmem>>, vector<1x30xf32>
    %32 = vector.broadcast %31 : vector<1x30xf32> to vector<8x30xf32>
    %33 = arith.addf %30, %32 : vector<8x30xf32>
    %cst_9 = arith.constant 0.000000e+00 : f32
    %34 = vector.broadcast %cst_9 : f32 to vector<8x30xf32>
    %35 = arith.maximumf %33, %34 : vector<8x30xf32>
    %c0_10 = arith.constant 0 : index
    %c0_11 = arith.constant 0 : index
    %36 = vector.load %arg6[%c0_10, %c0_11] : memref<4x3xf32, #tpu.memory_space<vmem>>, vector<4x3xf32>
    %c0_12 = arith.constant 0 : index
    %c0_13 = arith.constant 0 : index
    %37 = vector.load %arg8[%c0_12, %c0_13] : memref<1x3xf32, #tpu.memory_space<vmem>>, vector<1x3xf32>
    %38 = vector.extract_strided_slice %0 {offsets = [0, 0], sizes = [8, 1], strides = [1, 1]} : vector<8x4xf32> to vector<8x1xf32>
    %39 = vector.extract_strided_slice %36 {offsets = [0, 0], sizes = [1, 3], strides = [1, 1]} : vector<4x3xf32> to vector<1x3xf32>
    %40 = vector.broadcast %38 : vector<8x1xf32> to vector<8x3xf32>
    %41 = vector.broadcast %39 : vector<1x3xf32> to vector<8x3xf32>
    %42 = arith.mulf %40, %41 : vector<8x3xf32>
    %43 = vector.broadcast %37 : vector<1x3xf32> to vector<8x3xf32>
    %44 = arith.addf %42, %43 : vector<8x3xf32>
    %45 = vector.extract_strided_slice %0 {offsets = [0, 1], sizes = [8, 1], strides = [1, 1]} : vector<8x4xf32> to vector<8x1xf32>
    %46 = vector.extract_strided_slice %36 {offsets = [1, 0], sizes = [1, 3], strides = [1, 1]} : vector<4x3xf32> to vector<1x3xf32>
    %47 = vector.broadcast %45 : vector<8x1xf32> to vector<8x3xf32>
    %48 = vector.broadcast %46 : vector<1x3xf32> to vector<8x3xf32>
    %49 = arith.mulf %47, %48 : vector<8x3xf32>
    %50 = arith.addf %44, %49 : vector<8x3xf32>
    %51 = vector.extract_strided_slice %0 {offsets = [0, 2], sizes = [8, 1], strides = [1, 1]} : vector<8x4xf32> to vector<8x1xf32>
    %52 = vector.extract_strided_slice %36 {offsets = [2, 0], sizes = [1, 3], strides = [1, 1]} : vector<4x3xf32> to vector<1x3xf32>
    %53 = vector.broadcast %51 : vector<8x1xf32> to vector<8x3xf32>
    %54 = vector.broadcast %52 : vector<1x3xf32> to vector<8x3xf32>
    %55 = arith.mulf %53, %54 : vector<8x3xf32>
    %56 = arith.addf %50, %55 : vector<8x3xf32>
    %57 = vector.extract_strided_slice %0 {offsets = [0, 3], sizes = [8, 1], strides = [1, 1]} : vector<8x4xf32> to vector<8x1xf32>
    %58 = vector.extract_strided_slice %36 {offsets = [3, 0], sizes = [1, 3], strides = [1, 1]} : vector<4x3xf32> to vector<1x3xf32>
    %59 = vector.broadcast %57 : vector<8x1xf32> to vector<8x3xf32>
    %60 = vector.broadcast %58 : vector<1x3xf32> to vector<8x3xf32>
    %61 = arith.mulf %59, %60 : vector<8x3xf32>
    %62 = arith.addf %56, %61 : vector<8x3xf32>
    %c0_14 = arith.constant 0 : index
    %c0_15 = arith.constant 0 : index
    %63 = vector.load %arg7[%c0_14, %c0_15] : memref<30x3xf32, #tpu.memory_space<vmem>>, vector<30x3xf32>
    %cst_16 = arith.constant dense<0.000000e+00> : vector<8x3xf32>
    %64 = tpu.matmul %35, %63, %cst_16 {dimension_numbers = #tpu.dot_dimension_numbers<[1], [0], [0], [1], [0, 0, 1, 1], [], []>} : vector<8x30xf32>, vector<30x3xf32>, vector<8x3xf32> -> vector<8x3xf32>
    %65 = arith.addf %62, %64 : vector<8x3xf32>
    %c0_17 = arith.constant 0 : index
    %c0_18 = arith.constant 0 : index
    %66 = vector.load %arg9[%c0_17, %c0_18] : memref<8x3xf32, #tpu.memory_space<vmem>>, vector<8x3xf32>
    tpu.vector_store %arg9[%c0_17, %c0_18], %65 {strides = array<i32>} : memref<8x3xf32, #tpu.memory_space<vmem>>, vector<8x3xf32>,
    return
  }
  func.func @transform_0(%arg0: i32) -> (i32, i32) {
    %c0_i32 = arith.constant 0 : i32
    %c0_i32_0 = arith.constant 0 : i32
    return %arg0, %c0_i32 : i32, i32
  }
  func.func @transform_1(%arg0: i32) -> (i32, i32) {
    %c0_i32 = arith.constant 0 : i32
    %c0_i32_0 = arith.constant 0 : i32
    %c0_i32_1 = arith.constant 0 : i32
    return %c0_i32, %c0_i32_0 : i32, i32
  }
  func.func @transform_2(%arg0: i32) -> (i32, i32) {
    %c0_i32 = arith.constant 0 : i32
    %c0_i32_0 = arith.constant 0 : i32
    %c0_i32_1 = arith.constant 0 : i32
    return %c0_i32, %c0_i32_0 : i32, i32
  }
  func.func @transform_3(%arg0: i32) -> (i32, i32) {
    %c0_i32 = arith.constant 0 : i32
    %c0_i32_0 = arith.constant 0 : i32
    %c0_i32_1 = arith.constant 0 : i32
    return %c0_i32, %c0_i32_0 : i32, i32
  }
  func.func @transform_4(%arg0: i32) -> (i32, i32) {
    %c0_i32 = arith.constant 0 : i32
    %c0_i32_0 = arith.constant 0 : i32
    %c0_i32_1 = arith.constant 0 : i32
    return %c0_i32, %c0_i32_0 : i32, i32
  }
  func.func @transform_5(%arg0: i32) -> (i32, i32) {
    %c0_i32 = arith.constant 0 : i32
    %c0_i32_0 = arith.constant 0 : i32
    %c0_i32_1 = arith.constant 0 : i32
    return %c0_i32, %c0_i32_0 : i32, i32
  }
  func.func @transform_6(%arg0: i32) -> (i32, i32) {
    %c0_i32 = arith.constant 0 : i32
    %c0_i32_0 = arith.constant 0 : i32
    %c0_i32_1 = arith.constant 0 : i32
    return %c0_i32, %c0_i32_0 : i32, i32
  }
  func.func @transform_7(%arg0: i32) -> (i32, i32) {
    %c0_i32 = arith.constant 0 : i32
    %c0_i32_0 = arith.constant 0 : i32
    %c0_i32_1 = arith.constant 0 : i32
    return %c0_i32, %c0_i32_0 : i32, i32
  }
  func.func @transform_8(%arg0: i32) -> (i32, i32) {
    %c0_i32 = arith.constant 0 : i32
    %c0_i32_0 = arith.constant 0 : i32
    return %arg0, %c0_i32 : i32, i32
  }
}

</mosaic_0001>

<bundles_post_ra>
// kernel: network_forward.1
= control target key start
LH: loop header
LB: loop body
LE: loop exit
PB: predicated region body
PF: predicated region fallthrough
CT: control target
= control target key end

     0   :  { %13 = vsyncpa [#allocation3], 0  ;;  %s599_s0 = inlined_call_operand.vmem [shape: f32[2,4], index: 0, kind: input, shape index: {}]   ;;  %s600_s1 = inlined_call_operand.vmem [shape: f32[4,30], index: 1, kind: input, shape index: {}]   ;;  %s601_s2 = inlined_call_operand.hbm [shape: f32[1,30], index: 2, kind: input, shape index: {}]   ;;  %s602_s3 = inlined_call_operand.vmem [shape: f32[30,30], index: 3, kind: input, shape index: {}]   ;;  %s603_s4 = inlined_call_operand.hbm [shape: f32[1,30], index: 4, kind: input, shape index: {}]   ;;  %s604_s5 = inlined_call_operand.vmem [shape: f32[4,3], index: 5, kind: input, shape index: {}]   ;;  %s605_s6 = inlined_call_operand.vmem [shape: f32[30,3], index: 6, kind: input, shape index: {}]   ;;  %s606_s7 = inlined_call_operand.hbm [shape: f32[1,3], index: 7, kind: input, shape index: {}]   ;;  %s607_s8 = inlined_call_operand.hbm [shape: f32[2,3], index: 8, kind: output, shape index: {}]  }
   0x1   :  { %14 = vsyncpa [#allocation6], 0 }
   0x2   :  { %15 = vsyncpa [#allocation4], 0  ;;  %s483_s27 = smov [#allocation5]   ;;  %s484_s29 = smov [#allocation2]  }
   0x3   :  { %s38_s28 = sshll.u32 %s483_s27, 4  ;;  %s26_s30 = sshll.u32 %s484_s29, 4  ;;  %s39_s28 = int_to_ptr.vmem [resolvable:$true] %s38_s28  ;;  %s27_s30 = int_to_ptr.vmem [resolvable:$true] %s26_s30 }
   0x4   :  { %s405_s9 = scalar_lea.vmem %s39_s28, 16  ;;  %s409_s10 = scalar_lea.vmem %s39_s28, 32 }
   0x5   :  { %p406_p0 = scmp.ne.s32.totalorder %s39_s28, %s405_s9  ;;  %p410_p1 = scmp.lt.s32.totalorder %s39_s28, %s39_s28 }
   0x6   :  { %p411_p2 = scmp.lt.s32.totalorder %s409_s10, %s405_s9 }
   0x8   :  { %p412_p3 = por %p411_p2, %p410_p1 }
   0xa   :  { %p413_p4 = pnand %p412_p3, %p406_p0 }
   0xc   :  { %416 = shalt.err (!%p413_p4)
}
   0xd   :  { %41 = dma.hbm_to_vmem [thread:$0]  %s603_s4, 16, %s39_s28, [#allocation6]  }
   0xe   :  { %s425_s13 = scalar_lea.vmem %s27_s30, 16  ;;  %s429_s14 = scalar_lea.vmem %s27_s30, 32 }
   0xf   :  { %p426_p5 = scmp.ne.s32.totalorder %s27_s30, %s425_s13  ;;  %p430_p6 = scmp.lt.s32.totalorder %s27_s30, %s27_s30 }
  0x10   :  { %p431_p7 = scmp.lt.s32.totalorder %s429_s14, %s425_s13 }
  0x12   :  { %p432_p8 = por %p431_p7, %p430_p6 }
  0x14   :  { %p433_p9 = pnand %p432_p8, %p426_p5 }
  0x16   :  { %436 = shalt.err (!%p433_p9)
}
  0x17   :  { %29 = dma.hbm_to_vmem [thread:$0]  %s601_s2, 16, %s27_s30, [#allocation3]  }
  0x18   :  { %s485_s17 = smov [#allocation7]  }
  0x19   :  { %s52_s18 = sshll.u32 %s485_s17, 4  ;;  %s53_s18 = int_to_ptr.vmem [resolvable:$true] %s52_s18 }
  0x1a   :  { %s445_s19 = scalar_lea.vmem %s53_s18, 16  ;;  %s449_s20 = scalar_lea.vmem %s53_s18, 32 }
  0x1b   :  { %p446_p10 = scmp.ne.s32.totalorder %s53_s18, %s445_s19  ;;  %p450_p11 = scmp.lt.s32.totalorder %s53_s18, %s53_s18 }
  0x1c   :  { %p451_p12 = scmp.lt.s32.totalorder %s449_s20, %s445_s19 }
  0x1e   :  { %p452_p13 = por %p451_p12, %p450_p11 }
  0x20   :  { %p453_p0 = pnand %p452_p13, %p446_p10 }
  0x22   :  { %456 = shalt.err (!%p453_p0)
}
  0x23   :  { %55 = dma.hbm_to_vmem [thread:$0]  %s606_s7, 16, %s53_s18, [#allocation6]  }
  0x24   :  { %477 = dma.done.wait [#allocation3], 16  }
  0x25   :  { %478 = vsyncadd [#allocation3], 4294967280 }
  0x26   :  { %479 = dma.done.wait [#allocation6], 32  }
  0x27   :  { %480 = vsyncadd [#allocation6], 4294967264  ;;  %v486_v0 = vmov 0   ;;  %v487_v1 = vmov 2   ;;  %v65_v2 = vld [vmem:[%s599_s0] sm:$0xff]  ;;  %v488_v3 = vmov 1   ;;  %v73_v11 = vlaneseq }
  0x28   :  { %390 = vset.pattern.permute.xlu0 %v486_v0  ;;  %392 = vset.pattern.permute.xlu1 %v487_v1  ;;  %v489_v4 = vmov 3   ;;  %v119_v5 = vld [vmem:[%s602_s3 + $0x18] sm:$0x3f]  ;;  %vm131_vm0 = vcmask 1045504   ;;  %v490_v6 = vmov 0.0   ;;  %v118_v7 = vld [vmem:[%s602_s3 + $0x10] sm:$0xff] }
  0x29   :  { %70 = vperm.xlu0 %390, %v65_v2   ;;  %96 = vperm.xlu1 %392, %v65_v2   ;;  %vm491_vm1 = vmmov 0   ;;  %v117_v8 = vld [vmem:[%s602_s3 + $0x8] sm:$0xff]  ;;  %v116_v9 = vld [vmem:[%s602_s3] sm:$0xff]  ;;  %v241_v10 = vld [vmem:[%s605_s6 + $0x18] sm:$0x3f]  ;;  %v74_v12 = vshrl.u32 %v73_v11, 7 }
  0x2a   :  { %356 = vmatprep.subr.mxu0 %v490_v6  ;;  %367 = vmatprep.subr.mxu1 %v490_v6  ;;  %v66_v15 = vld [vmem:[%s600_s1] sm:$0xf]  ;;  %v343_v31 = vld [vmem:[#allocation7] ss:$0 sm:$0xff]  ;;  %vm127_vm2 = vcmask 244736   ;;  %v240_v50 = vld [vmem:[%s605_s6 + $0x10] sm:$0xff] }
  0x2b   :  { %357 = vmatpush3.msk.msra.mxu0 %vm131_vm0, %v119_v5  ;;  %364 = vmatprep.mubr.msk.f32.mxu0 %vm491_vm1, %v490_v6  ;;  %v75_v13 = vsub.s32 0, %v74_v12  ;;  %v101_v14 = vsub.s32 2, %v74_v12  ;;  %v206_v16 = vld [vmem:[%s604_s5] sm:$0xf]  ;;  %v91_v20 = vsub.s32 1, %v74_v12  ;;  %v111_v21 = vsub.s32 3, %v74_v12 }
  0x2c   :  { %358 = vmatprep.subr.mxu0 %v490_v6  ;;  %375 = vmatprep.mubr.msk.f32.mxu1 %vm491_vm1, %v490_v6  ;;  %v339_v27 = vld [vmem:[#allocation2] ss:$0 sm:$0xff]  ;;  %v239_v51 = vld [vmem:[%s605_s6 + $0x8] sm:$0xff]  ;;  %v340_v53 = vld [vmem:[#allocation5] ss:$0 sm:$0xff]  ;;  %vm319_vm3 = vcmask 23552  }
  0x2d   :  { %391 = vset.pattern.permute.xlu0 %v488_v3  ;;  %393 = vset.pattern.permute.xlu1 %v489_v4  ;;  %v76_v17 = vrot.slane %v66_v15, %v75_v13  ;;  %v211_v18 = vrot.slane %v206_v16, %v75_v13  ;;  %v229_v19 = vrot.slane %v206_v16, %v101_v14  ;;  %v238_v52 = vld [vmem:[%s605_s6] sm:$0xff] }
  0x2e   :  { %86 = vperm.xlu0 %391, %v65_v2   ;;  %106 = vperm.xlu1 %393, %v65_v2   ;;  %v92_v28 = vrot.slane %v66_v15, %v91_v20  ;;  %v223_v29 = vrot.slane %v206_v16, %v91_v20  ;;  %v235_v30 = vrot.slane %v206_v16, %v111_v21 }
  0x2f   :  { %359 = vmatpush3.msra.mxu0 %v118_v7  ;;  %368 = vmatpush3.msk.msra.mxu1 %vm131_vm0, %v241_v10  ;;  %v102_v32 = vrot.slane %v66_v15, %v101_v14  ;;  %v112_v33 = vrot.slane %v66_v15, %v111_v21 }
  0x30   :  { %360 = vmatprep.subr.mxu0 %v490_v6  ;;  %369 = vmatprep.subr.mxu1 %v490_v6 }
  0x31   :  { %361 = vmatpush3.msra.mxu0 %v117_v8  ;;  %370 = vmatpush3.msra.mxu1 %v240_v50 }
  0x32   :  { %394 = vset.pattern.permute.xlu0 %v489_v4  ;;  %362 = vmatprep.subr.mxu0 %v490_v6 }
  0x33   :  { %363 = vmatpush3.msra.mxu0 %v116_v9  ;;  %371 = vmatprep.subr.mxu1 %v490_v6 }
  0x34   :  { %372 = vmatpush3.msra.mxu1 %v239_v51 }
  0x35   :  { %373 = vmatprep.subr.mxu1 %v490_v6 }
  0x36   :  { %374 = vmatpush3.msra.mxu1 %v238_v52 }
  0xa4   :  { %v71_v22 = vpop.permute.xlu0 %70  ;;  %v97_v23 = vpop.permute.xlu1 %96 }
  0xa5   :  { %v77_v24 = vmul.f32 %v76_v17, %v71_v22  ;;  %v212_v25 = vmul.f32 %v211_v18, %v71_v22  ;;  %v230_v26 = vmul.f32 %v229_v19, %v97_v23  ;;  %v103_v41 = vmul.f32 %v102_v32, %v97_v23 }
  0xa7   :  { %v84_v34 = vadd.f32 %v339_v27, %v77_v24  ;;  %v219_v37 = vadd.f32 %v343_v31, %v212_v25 }
  0xa9   :  { %v87_v35 = vpop.permute.xlu0 %86  ;;  %v107_v36 = vpop.permute.xlu1 %106 }
  0xaa   :  { %v93_v38 = vmul.f32 %v92_v28, %v87_v35  ;;  %v224_v39 = vmul.f32 %v223_v29, %v87_v35  ;;  %v236_v40 = vmul.f32 %v235_v30, %v107_v36  ;;  %v113_v44 = vmul.f32 %v112_v33, %v107_v36 }
  0xac   :  { %v94_v42 = vadd.f32 %v93_v38, %v84_v34  ;;  %v225_v43 = vadd.f32 %v224_v39, %v219_v37 }
  0xae   :  { %v104_v45 = vadd.f32 %v103_v41, %v94_v42  ;;  %v231_v46 = vadd.f32 %v230_v26, %v225_v43 }
  0xb0   :  { %v114_v47 = vadd.f32 %v113_v44, %v104_v45  ;;  %v237_v48 = vadd.f32 %v236_v40, %v231_v46 }
  0xb2   :  { %395 = vtanh.f32 %v114_v47 }
  0xbf   :  { %v396_v49 = vpop.eup %395 }
  0xc0   :  { %365 = vmatmul.mubr.msk.f32.vlgmr.msra.gmra.mxu0 %vm127_vm2, %v396_v49 }
 0x180   :  { %v201_v54 = vpop.f32.mrf.mxu0 }
 0x181   :  { %v202_v55 = vadd.f32 %v340_v53, %v201_v54 }
 0x182   :  { %v366_v56 = vpop.f32.mrf.mxu0 }
 0x183   :  { %v205_v57 = vmax.f32 %v202_v55, 0.0 }
 0x185   :  { %376 = vmatmul.mubr.msk.f32.vlgmr.msra.gmra.mxu1 %vm127_vm2, %v205_v57 }
 0x245   :  { %v314_v58 = vpop.f32.mrf.mxu1 }
 0x246   :  { %v318_v59 = vadd.f32 %v314_v58, %v237_v48 }
 0x247   :  { %v377_v60 = vpop.f32.mrf.mxu1 }
 0x248   :  { %320 = vst.msk [vmem:[#allocation8] sm:$0xff] %vm319_vm3, %v318_v59 }
 0x249   :  { %325 = vsyncadd [#allocation4], 96  ;;  %s492_s16 = smov [#allocation8]  }
 0x24a   :  { %s326_s17 = sshll.u32 %s492_s16, 4  ;;  %s327_s17 = int_to_ptr.vmem [resolvable:$true] %s326_s17 }
 0x24b   :  { %s457_s18 = scalar_lea.vmem %s327_s17, 32  ;;  %s461_s6 = scalar_lea.vmem %s327_s17, 128 }
 0x24c   :  { %p458_p1 = scmp.ne.s32.totalorder %s327_s17, %s457_s18  ;;  %p462_p2 = scmp.lt.s32.totalorder %s327_s17, %s327_s17 }
 0x24d   :  { %p463_p3 = scmp.lt.s32.totalorder %s461_s6, %s457_s18 }
 0x24f   :  { %p464_p4 = por %p463_p3, %p462_p2 }
 0x251   :  { %p465_p5 = pnand %p464_p4, %p458_p1 }
 0x253   :  { %468 = shalt.err (!%p465_p5)
}
 0x254   :  { %s493_s19 = smov 32   ;;  %s494_s20 = smov 2  }
 0x255   :  { %332 = dma.vmem_to_hbm [thread:$0]  %s327_s17, 32, %s607_s8, [#allocation4], %s493_s19, %s493_s19, %s494_s20  }
 0x256   :  { %481 = dma.done.wait [#allocation4], 128  }
 0x257   :  { %482 = vsyncadd [#allocation4], 4294967168 }
 0x258   :  { %336 = vsyncpa [#allocation3], 1 }
 0x259   :  { %337 = vsyncpa [#allocation6], 1 }
 0x25a   :  { %338 = vsyncpa [#allocation4], 1 }

</bundles_post_ra>
